<compile_context>
chip_gen: v5e
topology: v5e:2x2
jax: 0.10.0
libtpu: 0.0.40
codegen_flags: <defaults>
</compile_context>

<pallas_src>
import functools

import jax
import jax.numpy as jnp
from jax import lax
from jax.experimental import pallas as pl
from jax.experimental.pallas import tpu as pltpu

_LANE = 128
_MAX_TILE_K = 2048                     # cap on the feature-dim tile (multiple of 128)
_FULL_WEIGHT_BYTES = 4 * 1024 * 1024   # hoist whole weight into VMEM below this size


def _round_up(a, m):
    return ((a + m - 1) // m) * m


def _linear1_kernel(x_ref, w_ref, b_ref, o_ref, *scratch,
                    tile_k, num_k, w_is_full, k_valid_last):
    # x_ref: (tile_b, tile_k)   w_ref: (tile_k|w_rows, G)   b_ref: (1,) in SMEM
    # o_ref: (tile_b, G)        scratch[0] (if any): (tile_b, G) f32 accumulator
    k = pl.program_id(1)

    if num_k > 1:
        acc_ref = scratch[0]

        @pl.when(k == 0)
        def _init():
            acc_ref[...] = jnp.zeros_like(acc_ref)

    x = x_ref[...]
    if k_valid_last is not None:
        # Ragged last K block: zero the out-of-range (stale/garbage) columns so
        # they cannot contaminate the accumulator (the zero-padded weight alone
        # is not enough if stale VMEM holds NaN/Inf).
        limit = jnp.where(k == num_k - 1, k_valid_last, tile_k)
        col = lax.broadcasted_iota(jnp.int32, x.shape, 1)
        x = jnp.where(col < limit, x, jnp.zeros_like(x))

    if w_is_full and num_k > 1:
        # Weight is resident in VMEM; slice the current K chunk (always aligned).
        w = w_ref[pl.ds(pl.multiple_of(k * tile_k, _LANE), tile_k), :]
    else:
        w = w_ref[...]

    part = jnp.dot(x, w, preferred_element_type=jnp.float32)

    if num_k == 1:
        o_ref[...] = (part + b_ref[0]).astype(o_ref.dtype)
    else:
        acc_ref[...] += part

        @pl.when(k == num_k - 1)
        def _finalize():
            o_ref[...] = (acc_ref[...] + b_ref[0]).astype(o_ref.dtype)


def linear1(x, w, b):
    """y = x @ w^T + b, with w shaped like torch.nn.Linear(D, 1).weight (1, D)."""
    B, D = x.shape
    dtype = x.dtype
    elt = jnp.dtype(dtype).itemsize

    w_col = jnp.reshape(jnp.asarray(w, dtype), (D, 1))
    b_smem = jnp.reshape(jnp.asarray(b, jnp.float32), (1,))     # scalar -> SMEM

    # --- generation-aware VMEM budgets (v5e/v6e: 128 MiB, v7x: 64 MiB per TC) ---
    try:
        vmem_cap = int(pltpu.get_tpu_info().vmem_capacity_bytes)
    except Exception:
        vmem_cap = 64 * 1024 * 1024                              # conservative
    vmem_limit = min(96 * 1024 * 1024, (3 * vmem_cap) // 4)
    x_buf_bytes = (16 * 1024 * 1024 if vmem_cap >= 100 * 1024 * 1024
                   else 8 * 1024 * 1024)

    # --- lane packing for small feature dims ----------------------------------
    if D < _LANE and _LANE % D == 0:
        G = _LANE // D                 # pack G batch rows per 128-lane row
    else:
        G = 1
    D2 = G * D

    # --- adaptive K tiling (padding waste per tile < 128 columns) -------------
    if D2 <= _MAX_TILE_K:
        tile_k, num_k, k_valid_last = D2, 1, None
        w_rows = D2
    else:
        num_k = -(-D2 // _MAX_TILE_K)
        tile_k = _round_up(-(-D2 // num_k), _LANE)
        num_k = -(-D2 // tile_k)
        rem = D2 - (num_k - 1) * tile_k
        k_valid_last = None if rem == tile_k else rem
        w_rows = num_k * tile_k        # weight zero-padded (tiny) to K tiles

    # --- pack x: copies only if D < 128 and B % G != 0 (<= G-1 pad rows) ------
    if G == 1:
        x2, rows = x, B
    else:
        pad = (-B) % G
        xp = x if pad == 0 else jnp.pad(x, ((0, pad), (0, 0)))
        rows = (B + pad) // G
        x2 = xp.reshape(rows, D2)      # free row-major reshape

    # --- weight: (w_rows, G); block-diagonal for the lane-packed path ---------
    wb = w_col if G == 1 else jnp.kron(jnp.eye(G, dtype=dtype), w_col)
    if w_rows > D2:
        wb = jnp.pad(wb, ((0, w_rows - D2), (0, 0)))             # zero K padding

    # --- batch tile: VMEM-budgeted, no rounding of B itself -------------------
    per_row = 2 * tile_k * elt + 2 * G * elt + (4 * G if num_k > 1 else 0)
    budget = max(per_row, (3 * vmem_limit) // 4 - w_rows * G * elt)
    tile_b = min(budget // per_row, max(1, x_buf_bytes // (tile_k * elt)))
    tile_b = max(_LANE, (tile_b // _LANE) * _LANE)
    if rows > _LANE:                   # >= 2 batch tiles so both v7x TCs get work
        tile_b = min(tile_b, _round_up(-(-rows // 2), _LANE))
    tile_b = min(tile_b, _round_up(rows, _LANE))

    grid = (pl.cdiv(rows, tile_b), num_k)

    w_is_full = (w_rows * G * elt) <= _FULL_WEIGHT_BYTES
    if w_is_full:
        w_spec = pl.BlockSpec((w_rows, G), lambda i, k: (0, 0))   # resident weight
    else:
        w_spec = pl.BlockSpec((tile_k, G), lambda i, k: (k, 0))   # streamed weight

    scratch_shapes = []
    if num_k > 1:
        scratch_shapes.append(pltpu.VMEM((tile_b, G), jnp.float32))

    kernel = functools.partial(_linear1_kernel, tile_k=tile_k, num_k=num_k,
                               w_is_full=w_is_full, k_valid_last=k_valid_last)

    out2 = pl.pallas_call(
        kernel,
        out_shape=jax.ShapeDtypeStruct((rows, G), dtype),
        grid_spec=pltpu.PrefetchScalarGridSpec(
            num_scalar_prefetch=0,
            grid=grid,
            in_specs=[
                pl.BlockSpec((tile_b, tile_k), lambda i, k: (i, k)),   # x stream
                w_spec,                                                # weight
                pl.BlockSpec(memory_space=pltpu.MemorySpace.SMEM),     # bias
            ],
            out_specs=pl.BlockSpec((tile_b, G), lambda i, k: (i, 0)),
            scratch_shapes=scratch_shapes,
        ),
        compiler_params=pltpu.CompilerParams(
            dimension_semantics=("parallel", "arbitrary"),
            vmem_limit_bytes=vmem_limit,
        ),
    )(x2, wb, b_smem)

    return out2.reshape(rows * G)[:B].reshape(B, 1)


if __name__ == "__main__":
    key = jax.random.PRNGKey(0)

    def run_case(B, D, kcase):
        kx, kw, kb = jax.random.split(kcase, 3)
        x = jax.random.normal(kx, (B, D), dtype=jnp.float32)
        # torch.nn.Linear-style U(-1/sqrt(D), 1/sqrt(D)) init
        bound = 1.0 / jnp.sqrt(jnp.float32(D))
        w = jax.random.uniform(kw, (1, D), minval=-bound, maxval=bound,
                               dtype=jnp.float32)
        b = jax.random.uniform(kb, (1,), minval=-bound, maxval=bound,
                               dtype=jnp.float32)
        out = linear1(x, w, b)
        jax.block_until_ready(out)
        ref = x @ w.T + b                       # same semantics as nn.Linear(D, 1)
        assert out.shape == (B, 1)
        assert jnp.allclose(out, ref, atol=2e-3, rtol=2e-3), (
            B, D, float(jnp.max(jnp.abs(out - ref))))

    keys = jax.random.split(key, 5)
    run_case(16, 32, keys[0])     # D < 128  -> lane-packed path (G = 4), no pad copy
    run_case(50, 300, keys[1])    # single-K, ragged batch via partial block (no pad)
    run_case(300, 256, keys[2])   # >= 2 batch tiles (megacore split), partial tail
    run_case(8, 4096, keys[3])    # K-tiled reduction (2 steps), f32 accumulator
    run_case(100, 2200, keys[4])  # ragged K tail -> in-kernel column masking

    print("KERNEL_OK")
</pallas_src>

<mosaic_0001>
module attributes {stable_mosaic.version = 11 : i64} {
  func.func @_linear1_kernel(%arg0: i32, %arg1: i32, %arg2: memref<128x128xf32, #tpu.memory_space<vmem>>, %arg3: memref<128x4xf32, #tpu.memory_space<vmem>>, %arg4: memref<1xf32, #tpu.memory_space<smem>>, %arg5: memref<128x4xf32, #tpu.memory_space<vmem>>) attributes {dimension_semantics = [#tpu.dimension_semantics<parallel>, #tpu.dimension_semantics<arbitrary>], iteration_bounds = array<i64: 1, 1>, scalar_prefetch = 0 : i64, scratch_operands = 0 : i64, tpu.core_type = #tpu.core_type<tc>, window_params = [{transform_indices = @transform_0, window_bounds = array<i64: 128, 128>}, {pipeline_mode = #tpu.pipeline_mode<synchronous>, transform_indices = @transform_1, window_bounds = array<i64: 128, 4>}, {transform_indices = @transform_2, window_bounds = array<i64: 1>}, {transform_indices = @transform_3, window_bounds = array<i64: 128, 4>}]} {
    %c0 = arith.constant 0 : index
    %c0_0 = arith.constant 0 : index
    %0 = vector.load %arg2[%c0, %c0_0] : memref<128x128xf32, #tpu.memory_space<vmem>>, vector<128x128xf32>
    %c0_1 = arith.constant 0 : index
    %c0_2 = arith.constant 0 : index
    %1 = vector.load %arg3[%c0_1, %c0_2] : memref<128x4xf32, #tpu.memory_space<vmem>>, vector<128x4xf32>
    %cst = arith.constant dense<0.000000e+00> : vector<128x4xf32>
    %2 = tpu.matmul %0, %1, %cst {dimension_numbers = #tpu.dot_dimension_numbers<[1], [0], [0], [1], [0, 0, 1, 1], [], []>} : vector<128x128xf32>, vector<128x4xf32>, vector<128x4xf32> -> vector<128x4xf32>
    %c0_3 = arith.constant 0 : index
    %3 = memref.load %arg4[%c0_3] : memref<1xf32, #tpu.memory_space<smem>>
    %4 = vector.broadcast %3 : f32 to vector<128x4xf32>
    %5 = arith.addf %2, %4 : vector<128x4xf32>
    %c0_4 = arith.constant 0 : index
    %c0_5 = arith.constant 0 : index
    %6 = vector.load %arg5[%c0_4, %c0_5] : memref<128x4xf32, #tpu.memory_space<vmem>>, vector<128x4xf32>
    tpu.vector_store %arg5[%c0_4, %c0_5], %5 {strides = array<i32>} : memref<128x4xf32, #tpu.memory_space<vmem>>, vector<128x4xf32>,
    return
  }
  func.func @transform_0(%arg0: i32, %arg1: i32) -> (i32, i32) {
    %c0_i32 = arith.constant 0 : i32
    return %arg0, %arg1 : i32, i32
  }
  func.func @transform_1(%arg0: i32, %arg1: i32) -> (i32, i32) {
    %c0_i32 = arith.constant 0 : i32
    %c0_i32_0 = arith.constant 0 : i32
    %c0_i32_1 = arith.constant 0 : i32
    return %c0_i32, %c0_i32_0 : i32, i32
  }
  func.func @transform_2(%arg0: i32, %arg1: i32) -> i32 {
    %c0_i32 = arith.constant 0 : i32
    %c0_i32_0 = arith.constant 0 : i32
    return %c0_i32 : i32
  }
  func.func @transform_3(%arg0: i32, %arg1: i32) -> (i32, i32) {
    %c0_i32 = arith.constant 0 : i32
    %c0_i32_0 = arith.constant 0 : i32
    return %arg0, %c0_i32 : i32, i32
  }
}

</mosaic_0001>

<bundles_post_ra>
// kernel: tpu_custom_call.1
= control target key start
LH: loop header
LB: loop body
LE: loop exit
PB: predicated region body
PF: predicated region fallthrough
CT: control target
= control target key end

     0   :  { %s368_s0 = inlined_call_operand.vmem [shape: f32[4,128], index: 0, kind: input, shape index: {}]   ;;  %s369_s1 = inlined_call_operand.vmem [shape: f32[128,4], index: 1, kind: input, shape index: {}]   ;;  %s370_s2 = inlined_call_operand.<no memory space> [shape: f32[1], index: 2, kind: input, shape index: {}]   ;;  %s371_s3 = inlined_call_operand.hbm [shape: f32[4,4], index: 3, kind: output, shape index: {}]  }
   0x1   :  { %v47_v0 = vld [vmem:[%s369_s1 + $0x78] sm:$0xff]  ;;  %v46_v1 = vld [vmem:[%s369_s1 + $0x70] sm:$0xff] }
   0x2   :  { %151 = vmatpush.msra.mxu2 %v47_v0  ;;  %152 = vmatpush.msra.mxu3 %v47_v0 }
   0x3   :  { %9 = vsyncpa [#allocation4], 0  ;;  %v45_v2 = vld [vmem:[%s369_s1 + $0x68] sm:$0xff]  ;;  %50 = vmatpush.msra.mxu0 %v47_v0  ;;  %150 = vmatpush.msra.mxu1 %v47_v0  ;;  %v44_v3 = vld [vmem:[%s369_s1 + $0x60] sm:$0xff]  ;;  %v49_v32 = vstv %s370_s2  ;;  %vm115_vm0 = vcmask 31744  }
   0x4   :  { %154 = vmatpush.msra.mxu2 %v46_v1  ;;  %155 = vmatpush.msra.mxu3 %v46_v1  ;;  %v43_v4 = vld [vmem:[%s369_s1 + $0x58] sm:$0xff]  ;;  %v42_v5 = vld [vmem:[%s369_s1 + $0x50] sm:$0xff]  ;;  %v41_v6 = vld [vmem:[%s369_s1 + $0x48] sm:$0xff] }
   0x5   :  { %51 = vmatpush.msra.mxu0 %v46_v1  ;;  %153 = vmatpush.msra.mxu1 %v46_v1  ;;  %v40_v7 = vld [vmem:[%s369_s1 + $0x40] sm:$0xff]  ;;  %v39_v8 = vld [vmem:[%s369_s1 + $0x38] sm:$0xff]  ;;  %v38_v9 = vld [vmem:[%s369_s1 + $0x30] sm:$0xff] }
   0x6   :  { %157 = vmatpush.msra.mxu2 %v45_v2  ;;  %158 = vmatpush.msra.mxu3 %v45_v2  ;;  %v37_v10 = vld [vmem:[%s369_s1 + $0x28] sm:$0xff]  ;;  %v36_v11 = vld [vmem:[%s369_s1 + $0x20] sm:$0xff]  ;;  %v35_v12 = vld [vmem:[%s369_s1 + $0x18] sm:$0xff] }
   0x7   :  { %52 = vmatpush.msra.mxu0 %v45_v2  ;;  %156 = vmatpush.msra.mxu1 %v45_v2  ;;  %v34_v13 = vld [vmem:[%s369_s1 + $0x10] sm:$0xff]  ;;  %v33_v14 = vld [vmem:[%s369_s1 + $0x8] sm:$0xff]  ;;  %v32_v15 = vld [vmem:[%s369_s1] sm:$0xff] }
   0x8   :  { %160 = vmatpush.msra.mxu2 %v44_v3  ;;  %161 = vmatpush.msra.mxu3 %v44_v3  ;;  %v24_v16 = vld [vmem:[%s368_s0 + $0x40] sm:$0xff]  ;;  %v25_v20 = vld [vmem:[%s368_s0 + $0x48] sm:$0xff]  ;;  %v26_v24 = vld [vmem:[%s368_s0 + $0x50] sm:$0xff] }
   0x9   :  { %53 = vmatpush.msra.mxu0 %v44_v3  ;;  %159 = vmatpush.msra.mxu1 %v44_v3  ;;  %v28_v17 = vld [vmem:[%s368_s0 + $0x60] sm:$0xff]  ;;  %v29_v21 = vld [vmem:[%s368_s0 + $0x68] sm:$0xff]  ;;  %v30_v25 = vld [vmem:[%s368_s0 + $0x70] sm:$0xff] }
   0xa   :  { %163 = vmatpush.msra.mxu2 %v43_v4  ;;  %164 = vmatpush.msra.mxu3 %v43_v4  ;;  %v16_v18 = vld [vmem:[%s368_s0] sm:$0xff]  ;;  %v17_v22 = vld [vmem:[%s368_s0 + $0x8] sm:$0xff]  ;;  %v18_v26 = vld [vmem:[%s368_s0 + $0x10] sm:$0xff] }
   0xb   :  { %54 = vmatpush.msra.mxu0 %v43_v4  ;;  %162 = vmatpush.msra.mxu1 %v43_v4  ;;  %v20_v19 = vld [vmem:[%s368_s0 + $0x20] sm:$0xff]  ;;  %v21_v23 = vld [vmem:[%s368_s0 + $0x28] sm:$0xff]  ;;  %v22_v27 = vld [vmem:[%s368_s0 + $0x30] sm:$0xff] }
   0xc   :  { %166 = vmatpush.msra.mxu2 %v42_v5  ;;  %167 = vmatpush.msra.mxu3 %v42_v5  ;;  %v27_v28 = vld [vmem:[%s368_s0 + $0x58] sm:$0xff] }
   0xd   :  { %55 = vmatpush.msra.mxu0 %v42_v5  ;;  %165 = vmatpush.msra.mxu1 %v42_v5  ;;  %v31_v29 = vld [vmem:[%s368_s0 + $0x78] sm:$0xff] }
   0xe   :  { %169 = vmatpush.msra.mxu2 %v41_v6  ;;  %170 = vmatpush.msra.mxu3 %v41_v6  ;;  %v19_v30 = vld [vmem:[%s368_s0 + $0x18] sm:$0xff] }
   0xf   :  { %56 = vmatpush.msra.mxu0 %v41_v6  ;;  %168 = vmatpush.msra.mxu1 %v41_v6  ;;  %v23_v31 = vld [vmem:[%s368_s0 + $0x38] sm:$0xff] }
  0x10   :  { %172 = vmatpush.msra.mxu2 %v40_v7  ;;  %173 = vmatpush.msra.mxu3 %v40_v7 }
  0x11   :  { %57 = vmatpush.msra.mxu0 %v40_v7  ;;  %171 = vmatpush.msra.mxu1 %v40_v7 }
  0x12   :  { %175 = vmatpush.msra.mxu2 %v39_v8  ;;  %176 = vmatpush.msra.mxu3 %v39_v8 }
  0x13   :  { %58 = vmatpush.msra.mxu0 %v39_v8  ;;  %174 = vmatpush.msra.mxu1 %v39_v8 }
  0x14   :  { %178 = vmatpush.msra.mxu2 %v38_v9  ;;  %179 = vmatpush.msra.mxu3 %v38_v9 }
  0x15   :  { %59 = vmatpush.msra.mxu0 %v38_v9  ;;  %177 = vmatpush.msra.mxu1 %v38_v9 }
  0x16   :  { %181 = vmatpush.msra.mxu2 %v37_v10  ;;  %182 = vmatpush.msra.mxu3 %v37_v10 }
  0x17   :  { %60 = vmatpush.msra.mxu0 %v37_v10  ;;  %180 = vmatpush.msra.mxu1 %v37_v10 }
  0x18   :  { %184 = vmatpush.msra.mxu2 %v36_v11  ;;  %185 = vmatpush.msra.mxu3 %v36_v11 }
  0x19   :  { %61 = vmatpush.msra.mxu0 %v36_v11  ;;  %183 = vmatpush.msra.mxu1 %v36_v11 }
  0x1a   :  { %187 = vmatpush.msra.mxu2 %v35_v12  ;;  %188 = vmatpush.msra.mxu3 %v35_v12 }
  0x1b   :  { %62 = vmatpush.msra.mxu0 %v35_v12  ;;  %186 = vmatpush.msra.mxu1 %v35_v12 }
  0x1c   :  { %190 = vmatpush.msra.mxu2 %v34_v13  ;;  %191 = vmatpush.msra.mxu3 %v34_v13 }
  0x1d   :  { %63 = vmatpush.msra.mxu0 %v34_v13  ;;  %189 = vmatpush.msra.mxu1 %v34_v13 }
  0x1e   :  { %193 = vmatpush.msra.mxu2 %v33_v14  ;;  %194 = vmatpush.msra.mxu3 %v33_v14 }
  0x1f   :  { %64 = vmatpush.msra.mxu0 %v33_v14  ;;  %192 = vmatpush.msra.mxu1 %v33_v14 }
  0x20   :  { %196 = vmatpush.msra.mxu2 %v32_v15  ;;  %197 = vmatpush.msra.mxu3 %v32_v15 }
  0x21   :  { %90 = vmatmul.f32.vlgmr.msra.gmra.mxu2 %v24_v16  ;;  %102 = vmatmul.f32.vlgmr.msra.gmra.mxu3 %v28_v17 }
  0x22   :  { %65 = vmatpush.msra.mxu0 %v32_v15  ;;  %195 = vmatpush.msra.mxu1 %v32_v15 }
  0x23   :  { %66 = vmatmul.f32.vlgmr.msra.gmra.mxu0 %v16_v18  ;;  %78 = vmatmul.f32.vlgmr.msra.gmra.mxu1 %v20_v19 }
  0x29   :  { %93 = vmatmul.f32.gmra.mxu2 %v25_v20  ;;  %105 = vmatmul.f32.gmra.mxu3 %v29_v21 }
  0x2b   :  { %69 = vmatmul.f32.gmra.mxu0 %v17_v22  ;;  %81 = vmatmul.f32.gmra.mxu1 %v21_v23 }
  0x31   :  { %96 = vmatmul.f32.gmra.mxu2 %v26_v24  ;;  %108 = vmatmul.f32.gmra.mxu3 %v30_v25 }
  0x33   :  { %72 = vmatmul.f32.gmra.mxu0 %v18_v26  ;;  %84 = vmatmul.f32.gmra.mxu1 %v22_v27 }
  0x39   :  { %99 = vmatmul.f32.gmra.mxu2 %v27_v28  ;;  %111 = vmatmul.f32.gmra.mxu3 %v31_v29 }
  0x3b   :  { %75 = vmatmul.f32.gmra.mxu0 %v19_v30  ;;  %87 = vmatmul.f32.gmra.mxu1 %v23_v31 }
  0xa0   :  { %v67_v33 = vpop.f32.mrf.mxu0  ;;  %v79_v34 = vpop.f32.mrf.mxu1 }
  0xa1   :  { %v68_v35 = vadd.f32 %v67_v33, %v49_v32  ;;  %v80_v36 = vadd.f32 %v79_v34, %v49_v32 }
  0xa3   :  { %116 = vst.msk [vmem:[#allocation3] sm:$0xff] %vm115_vm0, %v68_v35 }
  0xa4   :  { %120 = vst.msk [vmem:[#allocation3 + $0x20] sm:$0xff] %vm115_vm0, %v80_v36  ;;  %v91_v37 = vpop.f32.mrf.mxu2  ;;  %v103_v38 = vpop.f32.mrf.mxu3 }
  0xa5   :  { %v92_v39 = vadd.f32 %v91_v37, %v49_v32  ;;  %v104_v40 = vadd.f32 %v103_v38, %v49_v32 }
  0xa7   :  { %124 = vst.msk [vmem:[#allocation3 + $0x40] sm:$0xff] %vm115_vm0, %v92_v39 }
  0xa8   :  { %128 = vst.msk [vmem:[#allocation3 + $0x60] sm:$0xff] %vm115_vm0, %v104_v40  ;;  %v70_v41 = vpop.f32.mrf.mxu0  ;;  %v82_v42 = vpop.f32.mrf.mxu1 }
  0xa9   :  { %v71_v43 = vadd.f32 %v70_v41, %v49_v32  ;;  %v83_v44 = vadd.f32 %v82_v42, %v49_v32 }
  0xab   :  { %117 = vst.msk [vmem:[#allocation3 + $0x8] sm:$0xff] %vm115_vm0, %v71_v43 }
  0xac   :  { %121 = vst.msk [vmem:[#allocation3 + $0x28] sm:$0xff] %vm115_vm0, %v83_v44  ;;  %v94_v45 = vpop.f32.mrf.mxu2  ;;  %v106_v46 = vpop.f32.mrf.mxu3 }
  0xad   :  { %v95_v47 = vadd.f32 %v94_v45, %v49_v32  ;;  %v107_v48 = vadd.f32 %v106_v46, %v49_v32 }
  0xaf   :  { %125 = vst.msk [vmem:[#allocation3 + $0x48] sm:$0xff] %vm115_vm0, %v95_v47 }
  0xb0   :  { %129 = vst.msk [vmem:[#allocation3 + $0x68] sm:$0xff] %vm115_vm0, %v107_v48  ;;  %v73_v49 = vpop.f32.mrf.mxu0  ;;  %v85_v50 = vpop.f32.mrf.mxu1 }
  0xb1   :  { %v74_v51 = vadd.f32 %v73_v49, %v49_v32  ;;  %v86_v52 = vadd.f32 %v85_v50, %v49_v32 }
  0xb3   :  { %118 = vst.msk [vmem:[#allocation3 + $0x10] sm:$0xff] %vm115_vm0, %v74_v51 }
  0xb4   :  { %122 = vst.msk [vmem:[#allocation3 + $0x30] sm:$0xff] %vm115_vm0, %v86_v52  ;;  %v97_v53 = vpop.f32.mrf.mxu2  ;;  %v109_v54 = vpop.f32.mrf.mxu3 }
  0xb5   :  { %v98_v55 = vadd.f32 %v97_v53, %v49_v32  ;;  %v110_v56 = vadd.f32 %v109_v54, %v49_v32 }
  0xb7   :  { %126 = vst.msk [vmem:[#allocation3 + $0x50] sm:$0xff] %vm115_vm0, %v98_v55 }
  0xb8   :  { %130 = vst.msk [vmem:[#allocation3 + $0x70] sm:$0xff] %vm115_vm0, %v110_v56  ;;  %v76_v57 = vpop.f32.mrf.mxu0  ;;  %v88_v58 = vpop.f32.mrf.mxu1 }
  0xb9   :  { %v77_v59 = vadd.f32 %v76_v57, %v49_v32  ;;  %v89_v60 = vadd.f32 %v88_v58, %v49_v32 }
  0xbb   :  { %119 = vst.msk [vmem:[#allocation3 + $0x18] sm:$0xff] %vm115_vm0, %v77_v59 }
  0xbc   :  { %123 = vst.msk [vmem:[#allocation3 + $0x38] sm:$0xff] %vm115_vm0, %v89_v60  ;;  %v100_v61 = vpop.f32.mrf.mxu2  ;;  %v112_v62 = vpop.f32.mrf.mxu3 }
  0xbd   :  { %v101_v63 = vadd.f32 %v100_v61, %v49_v32  ;;  %v113_v0 = vadd.f32 %v112_v62, %v49_v32 }
  0xbf   :  { %127 = vst.msk [vmem:[#allocation3 + $0x58] sm:$0xff] %vm115_vm0, %v101_v63 }
  0xc0   :  { %131 = vst.msk [vmem:[#allocation3 + $0x78] sm:$0xff] %vm115_vm0, %v113_v0 }
  0xc1   :  { %135 = vsyncadd [#allocation4], 1984  ;;  %s138_s1 = sshll.u32 %s371_s3, 4  ;;  %s227_s23 = smov [#allocation3]   ;;  %s139_s1 = int_to_ptr.hbm [resolvable:$true] %s138_s1 }
  0xc2   :  { %s136_s24 = sshll.u32 %s227_s23, 4  ;;  %s228_s25 = smov 64   ;;  %s137_s24 = int_to_ptr.vmem [resolvable:$true] %s136_s24 }
  0xc3   :  { %s229_s26 = smov 4  }
  0xc4   :  { %144 = dma.vmem_to_hbm [thread:$0]  %s137_s24, 64, %s139_s1, [#allocation4], %s228_s25, %s228_s25, %s229_s26  }
  0xc5   :  { %225 = dma.done.wait [#allocation4], 2048  }
  0xc6   :  { %226 = vsyncadd [#allocation4], 4294965248 }
  0xc7   :  { %149 = vsyncpa [#allocation4], 1 }

</bundles_post_ra>
